<compile_context>
chip_gen: v7x
topology: tpu7x:2x2x1
jax: 0.10.0
libtpu: 0.0.40
codegen_flags: <defaults>
</compile_context>

<pallas_src>
import functools

import jax
import jax.numpy as jnp
from jax.experimental import pallas as pl
from jax.experimental.pallas import tpu as pltpu

_LANES = 128


def _round_up(x, m):
    return ((x + m - 1) // m) * m


def _input_buffer_budget():
    """Total bytes for the 2 inputs x 2 pipeline buffers, per TensorCore."""
    try:
        vmem_bytes = int(pltpu.get_tpu_info().vmem_capacity_bytes)
    except Exception:
        vmem_bytes = 64 * 1024 * 1024          # conservative (v7x per-core VMEM)
    if vmem_bytes >= 100 * 1024 * 1024:        # v5e / v6e: 128 MiB per core
        return 24 * 1024 * 1024
    return 16 * 1024 * 1024                    # v7x: 64 MiB per core


def _loss_sums_kernel(p_ref, t_ref, r2_ref, d2_ref, carry_ref, *,
                      fp, f, n_flat, rows_per_split, tile_rows, needs_carry):
    """Accumulates lane-partial sums of r^2 and diff(r)^2 into resident (8,128) blocks."""
    c = pl.program_id(0)          # parallel split index (one per TensorCore on v7x)
    i = pl.program_id(1)          # sequential reduction step

    @pl.when(i == 0)
    def _init():
        r2_ref[...] = jnp.zeros_like(r2_ref)
        d2_ref[...] = jnp.zeros_like(d2_ref)

    r = p_ref[...].astype(jnp.float32) - t_ref[...].astype(jnp.float32)

    local_row = jax.lax.broadcasted_iota(jnp.int32, r.shape, 0)
    lane = jax.lax.broadcasted_iota(jnp.int32, r.shape, 1)
    row0 = c * rows_per_split + i * tile_rows       # logical (unclamped) start row
    flat = (row0 + local_row) * _LANES + lane       # flat index in the padded (B_pad, Fp) layout

    if f == 1:
        elem_valid = flat < n_flat
        diff_valid = elem_valid & (flat >= 1)
    else:
        step = flat & (fp - 1)                      # fp is a power of two -> bitwise, no modulo
        in_range = flat < n_flat
        elem_valid = in_range if fp == f else (in_range & (step < f))
        diff_valid = elem_valid & (step >= 1)

    prev = pltpu.roll(r, shift=1, axis=1)           # prev[., l] = r[., l-1]   (wraps at l == 0)
    if needs_carry:
        # lane 0 of a row: the flat-order neighbour is lane 127 of the row above.
        prev_row = pltpu.roll(prev, shift=1, axis=0)            # [row, 0] == r[row-1, 127]
        prev = jnp.where(lane == 0, prev_row, prev)
        # row 0 of the tile: the neighbour is the last element of the previous tile.
        carried = pltpu.roll(carry_ref[...], shift=1, axis=1)   # (1,128): [0,0] == prev tile last
        prev = jnp.where((local_row == 0) & (lane == 0), carried, prev)

    d = r - prev
    r2 = jnp.where(elem_valid, r * r, 0.0)
    d2 = jnp.where(diff_valid, d * d, 0.0)

    # Deferred reduction: only a sublane reduce per step; 128 lane-partial sums stay
    # resident in the output block and the wrapper does the final cross-lane reduce.
    r2_ref[0:1, :] += jnp.sum(r2, axis=0, keepdims=True)
    d2_ref[0:1, :] += jnp.sum(d2, axis=0, keepdims=True)

    if needs_carry:
        carry_ref[...] = r[tile_rows - 1:tile_rows, :]


def combined_loss(predictions, targets, weight_mse=0.6, weight_directional=0.4,
                  tile_rows=None):
    """Pallas equivalent of CombinedLoss.forward for (batch_size, future_steps)."""
    assert predictions.shape == targets.shape
    assert predictions.ndim == 2
    B, F = predictions.shape
    itemsize = jnp.dtype(predictions.dtype).itemsize

    n_mse = B * F
    n_dir = B * (F - 1) if F > 1 else B - 1

    # ---- layout: view the row-major data as (R, 128) lane-dense rows ----
    Fp = 1 if F == 1 else int(pl.next_power_of_2(F))
    if Fp <= _LANES:
        group = _LANES // Fp                 # original rows per 128-lane row
        B_pad = _round_up(B, group)
    else:
        B_pad = B                            # Fp is already a multiple of 128
    pad_b, pad_f = B_pad - B, Fp - F
    if pad_b or pad_f:
        # Single fused pad (the only extra HBM pass); the common case (power-of-two F,
        # B a multiple of 128/F) takes the zero-copy branch below.
        # TODO(synk): a scalar-prefetch gather index_map could avoid even this pad
        # for non-power-of-two F at the cost of a far more complex kernel.
        p_in = jnp.pad(predictions, ((0, pad_b), (0, pad_f)))
        t_in = jnp.pad(targets, ((0, pad_b), (0, pad_f)))
    else:
        p_in, t_in = predictions, targets
    n_flat = B * Fp                          # flat indices >= this are batch padding
    R = (B_pad * Fp) // _LANES
    p2 = p_in.reshape(R, _LANES)             # zero-copy row-major view
    t2 = t_in.reshape(R, _LANES)

    needs_carry = (F == 1) or (Fp > _LANES)

    # ---- tile height: biggest tile that keeps 2 inputs x 2 buffers inside budget ----
    budget = _input_buffer_budget()
    tile_bytes = budget // 4
    max_rows = max(32, (tile_bytes // (_LANES * itemsize)) // 32 * 32)
    if tile_rows is not None:
        want = max(8, (int(tile_rows) // 8) * 8)
    else:
        want = max_rows
        if (not needs_carry) and R >= 16:
            # guarantee >= 2 row-tiles so the v7x 2-TensorCore split has work for both
            want = min(want, _round_up(pl.cdiv(R, 2), 8))
    tr = R if want >= R else want            # tr < R is always a multiple of 8

    n_tiles = pl.cdiv(R, tr)
    n_split = 2 if (not needs_carry and n_tiles >= 2) else 1
    steps = pl.cdiv(n_tiles, n_split)
    rows_per_split = steps * tr
    last_block = n_tiles - 1

    kernel = functools.partial(
        _loss_sums_kernel, fp=Fp, f=F, n_flat=n_flat,
        rows_per_split=rows_per_split, tile_rows=tr, needs_carry=needs_carry)

    in_spec = pl.BlockSpec(
        (tr, _LANES),
        lambda c, i: (jnp.minimum(c * steps + i, last_block), 0))
    out_spec = pl.BlockSpec((8, _LANES), lambda c, i: (c, 0))
    out_sds = jax.ShapeDtypeStruct((n_split * 8, _LANES), jnp.float32)

    r2_parts, d2_parts = pl.pallas_call(
        kernel,
        out_shape=(out_sds, out_sds),
        grid=(n_split, steps),
        in_specs=[in_spec, in_spec],
        out_specs=(out_spec, out_spec),
        scratch_shapes=[pltpu.VMEM((1, _LANES), jnp.float32)],   # cross-tile carry (F==1 / F>128)
        compiler_params=pltpu.CompilerParams(
            dimension_semantics=("parallel", "arbitrary"),
            vmem_limit_bytes=budget + 4 * 1024 * 1024),
        cost_estimate=pl.CostEstimate(
            flops=8 * B_pad * Fp,
            transcendentals=0,
            bytes_accessed=2 * B_pad * Fp * itemsize + 2 * n_split * 8 * _LANES * 4),
    )(p2, t2)

    sum_r2 = jnp.sum(r2_parts)
    sum_d2 = jnp.sum(d2_parts)
    loss_mse = sum_r2 / n_mse
    loss_directional = (sum_d2 / n_dir) * 1000.0
    return weight_mse * loss_mse + weight_directional * loss_directional


def _reference(predictions, targets, weight_mse=0.6, weight_directional=0.4):
    """Pure-JAX reference mirroring the PyTorch CombinedLoss forward."""
    p = predictions.astype(jnp.float32)
    t = targets.astype(jnp.float32)
    loss_mse = jnp.mean(jnp.square(p - t))
    if t.shape[1] == 1:
        pred_diff = p[1:] - p[:-1]
        target_diff = t[1:] - t[:-1]
    else:
        pred_diff = p[:, 1:] - p[:, :-1]
        target_diff = t[:, 1:] - t[:, :-1]
    loss_dir = jnp.mean(jnp.square(pred_diff - target_diff)) * 1000.0
    return weight_mse * loss_mse + weight_directional * loss_dir


if __name__ == "__main__":
    key = jax.random.PRNGKey(0)

    def mk(k, shape, dtype):
        k1, k2 = jax.random.split(k)
        return (jax.random.normal(k1, shape, dtype=jnp.float32).astype(dtype),
                jax.random.normal(k2, shape, dtype=jnp.float32).astype(dtype))

    cases = [
        # (shape, dtype, kwargs, rtol)
        ((2, 8), jnp.float32, {}, 1e-4),                    # docstring shape
        ((512, 8), jnp.float32, {"tile_rows": 8}, 1e-4),    # zero-copy, multi-tile, 2-way split
        ((300, 8), jnp.float32, {"tile_rows": 8}, 1e-4),    # ragged last tile + clamped split tile
        ((512, 8), jnp.bfloat16, {"tile_rows": 16}, 1e-3),  # packed dtype
        ((64, 5), jnp.float32, {}, 1e-4),                   # non-power-of-two F (padded to 8)
        ((4, 1), jnp.float32, {}, 1e-4),                    # degenerate F == 1 (diff along batch)
        ((2048, 1), jnp.float32, {"tile_rows": 8}, 1e-4),   # F == 1 with cross-tile carry
        ((96, 200), jnp.float32, {"tile_rows": 8}, 1e-4),   # F > 128 (cross-row neighbours)
    ]

    keys = jax.random.split(key, len(cases))
    for k, (shape, dtype, kw, rtol) in zip(keys, cases):
        p_in, t_in = mk(k, shape, dtype)
        got = jax.block_until_ready(combined_loss(p_in, t_in, **kw))
        want = jax.block_until_ready(_reference(p_in, t_in))
        assert jnp.allclose(got, want, rtol=rtol, atol=1e-2), (shape, dtype, got, want)

    print("KERNEL_OK")
</pallas_src>

<mosaic_0001>
module attributes {stable_mosaic.version = 11 : i64} {
  func.func @_loss_sums_kernel(%arg0: i32, %arg1: i32, %arg2: memref<1x128xf32, #tpu.memory_space<vmem>>, %arg3: memref<1x128xf32, #tpu.memory_space<vmem>>, %arg4: memref<8x128xf32, #tpu.memory_space<vmem>>, %arg5: memref<8x128xf32, #tpu.memory_space<vmem>>, %arg6: memref<1x128xf32, #tpu.memory_space<vmem>>) attributes {dimension_semantics = [#tpu.dimension_semantics<parallel>, #tpu.dimension_semantics<arbitrary>], iteration_bounds = array<i64: 1, 1>, scalar_prefetch = 0 : i64, scratch_operands = 1 : i64, tpu.core_type = #tpu.core_type<tc>, window_params = [{transform_indices = @transform_0, window_bounds = array<i64: 1, 128>}, {transform_indices = @transform_1, window_bounds = array<i64: 1, 128>}, {transform_indices = @transform_2, window_bounds = array<i64: 8, 128>}, {transform_indices = @transform_3, window_bounds = array<i64: 8, 128>}]} {
    %c0_i32 = arith.constant 0 : i32
    %0 = arith.cmpi eq, %arg1, %c0_i32 : i32
    %1 = arith.extui %0 : i1 to i32
    %c0_i32_0 = arith.constant 0 : i32
    %2 = arith.cmpi ne, %1, %c0_i32_0 : i32
    scf.if %2 {
      %cst_18 = arith.constant 0.000000e+00 : f32
      %41 = vector.broadcast %cst_18 : f32 to vector<8x128xf32>
      %c0_19 = arith.constant 0 : index
      %c0_20 = arith.constant 0 : index
      %42 = vector.load %arg4[%c0_19, %c0_20] : memref<8x128xf32, #tpu.memory_space<vmem>>, vector<8x128xf32>
      tpu.vector_store %arg4[%c0_19, %c0_20], %41 {strides = array<i32>} : memref<8x128xf32, #tpu.memory_space<vmem>>, vector<8x128xf32>,
      %cst_21 = arith.constant 0.000000e+00 : f32
      %43 = vector.broadcast %cst_21 : f32 to vector<8x128xf32>
      %c0_22 = arith.constant 0 : index
      %c0_23 = arith.constant 0 : index
      %44 = vector.load %arg5[%c0_22, %c0_23] : memref<8x128xf32, #tpu.memory_space<vmem>>, vector<8x128xf32>
      tpu.vector_store %arg5[%c0_22, %c0_23], %43 {strides = array<i32>} : memref<8x128xf32, #tpu.memory_space<vmem>>, vector<8x128xf32>,
    } else {
    }
    %c0 = arith.constant 0 : index
    %c0_1 = arith.constant 0 : index
    %3 = vector.load %arg2[%c0, %c0_1] : memref<1x128xf32, #tpu.memory_space<vmem>>, vector<1x128xf32>
    %c0_2 = arith.constant 0 : index
    %c0_3 = arith.constant 0 : index
    %4 = vector.load %arg3[%c0_2, %c0_3] : memref<1x128xf32, #tpu.memory_space<vmem>>, vector<1x128xf32>
    %5 = arith.subf %3, %4 : vector<1x128xf32>
    %6 = tpu.iota {dimensions = array<i32: 0>} : vector<1x128xi32>
    %7 = tpu.iota {dimensions = array<i32: 1>} : vector<1x128xi32>
    %c1_i32 = arith.constant 1 : i32
    %8 = arith.muli %arg0, %c1_i32 : i32
    %c1_i32_4 = arith.constant 1 : i32
    %9 = arith.muli %arg1, %c1_i32_4 : i32
    %10 = arith.addi %8, %9 : i32
    %11 = vector.broadcast %10 : i32 to vector<1x128xi32>
    %12 = arith.addi %11, %6 : vector<1x128xi32>
    %c128_i32 = arith.constant 128 : i32
    %13 = vector.broadcast %c128_i32 : i32 to vector<1x128xi32>
    %14 = arith.muli %12, %13 : vector<1x128xi32>
    %15 = arith.addi %14, %7 : vector<1x128xi32>
    %c7_i32 = arith.constant 7 : i32
    %16 = vector.broadcast %c7_i32 : i32 to vector<1x128xi32>
    %17 = arith.andi %15, %16 : vector<1x128xi32>
    %c16_i32 = arith.constant 16 : i32
    %18 = vector.broadcast %c16_i32 : i32 to vector<1x128xi32>
    %19 = arith.cmpi slt, %15, %18 : vector<1x128xi32>
    %c1_i32_5 = arith.constant 1 : i32
    %20 = vector.broadcast %c1_i32_5 : i32 to vector<1x128xi32>
    %21 = arith.cmpi sge, %17, %20 : vector<1x128xi32>
    %22 = arith.andi %19, %21 : vector<1x128xi1>
    %c1_i32_6 = arith.constant 1 : i32
    %23 = tpu.dynamic_rotate %5 by %c1_i32_6 dim 1 : vector<1x128xf32>, i32 -> vector<1x128xf32>
    %24 = arith.subf %5, %23 : vector<1x128xf32>
    %25 = arith.mulf %5, %5 : vector<1x128xf32>
    %cst = arith.constant 0.000000e+00 : f32
    %26 = vector.broadcast %cst : f32 to vector<1x128xf32>
    %27 = arith.select %19, %25, %26 : vector<1x128xi1>, vector<1x128xf32>
    %28 = arith.mulf %24, %24 : vector<1x128xf32>
    %cst_7 = arith.constant 0.000000e+00 : f32
    %29 = vector.broadcast %cst_7 : f32 to vector<1x128xf32>
    %30 = arith.select %22, %28, %29 : vector<1x128xi1>, vector<1x128xf32>
    %c0_8 = arith.constant 0 : index
    %c0_9 = arith.constant 0 : index
    %31 = vector.load %arg4[%c0_8, %c0_9] : memref<8x128xf32, #tpu.memory_space<vmem>>, vector<1x128xf32>
    %cst_10 = arith.constant dense<0.000000e+00> : vector<128xf32>
    %32 = vector.multi_reduction <add>, %27, %cst_10 [0] : vector<1x128xf32> to vector<128xf32>
    %33 = vector.shape_cast %32 : vector<128xf32> to vector<1x128xf32>
    %34 = arith.addf %31, %33 : vector<1x128xf32>
    %c0_11 = arith.constant 0 : index
    %c0_12 = arith.constant 0 : index
    %35 = vector.load %arg4[%c0_11, %c0_12] : memref<8x128xf32, #tpu.memory_space<vmem>>, vector<1x128xf32>
    tpu.vector_store %arg4[%c0_11, %c0_12], %34 {strides = array<i32>} : memref<8x128xf32, #tpu.memory_space<vmem>>, vector<1x128xf32>,
    %c0_13 = arith.constant 0 : index
    %c0_14 = arith.constant 0 : index
    %36 = vector.load %arg5[%c0_13, %c0_14] : memref<8x128xf32, #tpu.memory_space<vmem>>, vector<1x128xf32>
    %cst_15 = arith.constant dense<0.000000e+00> : vector<128xf32>
    %37 = vector.multi_reduction <add>, %30, %cst_15 [0] : vector<1x128xf32> to vector<128xf32>
    %38 = vector.shape_cast %37 : vector<128xf32> to vector<1x128xf32>
    %39 = arith.addf %36, %38 : vector<1x128xf32>
    %c0_16 = arith.constant 0 : index
    %c0_17 = arith.constant 0 : index
    %40 = vector.load %arg5[%c0_16, %c0_17] : memref<8x128xf32, #tpu.memory_space<vmem>>, vector<1x128xf32>
    tpu.vector_store %arg5[%c0_16, %c0_17], %39 {strides = array<i32>} : memref<8x128xf32, #tpu.memory_space<vmem>>, vector<1x128xf32>,
    return
  }
  func.func @transform_0(%arg0: i32, %arg1: i32) -> (i32, i32) {
    %c1_i32 = arith.constant 1 : i32
    %0 = arith.muli %arg0, %c1_i32 : i32
    %1 = arith.addi %0, %arg1 : i32
    %c0_i32 = arith.constant 0 : i32
    %2 = arith.minsi %1, %c0_i32 : i32
    %c0_i32_0 = arith.constant 0 : i32
    %c0_i32_1 = arith.constant 0 : i32
    return %2, %c0_i32_0 : i32, i32
  }
  func.func @transform_1(%arg0: i32, %arg1: i32) -> (i32, i32) {
    %c1_i32 = arith.constant 1 : i32
    %0 = arith.muli %arg0, %c1_i32 : i32
    %1 = arith.addi %0, %arg1 : i32
    %c0_i32 = arith.constant 0 : i32
    %2 = arith.minsi %1, %c0_i32 : i32
    %c0_i32_0 = arith.constant 0 : i32
    %c0_i32_1 = arith.constant 0 : i32
    return %2, %c0_i32_0 : i32, i32
  }
  func.func @transform_2(%arg0: i32, %arg1: i32) -> (i32, i32) {
    %c0_i32 = arith.constant 0 : i32
    %c0_i32_0 = arith.constant 0 : i32
    return %arg0, %c0_i32 : i32, i32
  }
  func.func @transform_3(%arg0: i32, %arg1: i32) -> (i32, i32) {
    %c0_i32 = arith.constant 0 : i32
    %c0_i32_0 = arith.constant 0 : i32
    return %arg0, %c0_i32 : i32, i32
  }
}

</mosaic_0001>

<bundles_post_ra>
// kernel: tpu_custom_call.1
= control target key start
LH: loop header
LB: loop body
LE: loop exit
PB: predicated region body
PF: predicated region fallthrough
CT: control target
= control target key end

     0   :  { %9 = vsyncpa [#allocation4], 0  ;;  %s277_s0 = inlined_call_operand.hbm [shape: f32[1,128], index: 0, kind: input, shape index: {}]   ;;  %s278_s1 = inlined_call_operand.vmem [shape: f32[1,128], index: 1, kind: input, shape index: {}]   ;;  %s279_s2 = inlined_call_operand.hbm [shape: f32[8,128], index: 2, kind: output, shape index: {0}]   ;;  %s280_s3 = inlined_call_operand.hbm [shape: f32[8,128], index: 3, kind: output, shape index: {1}]  }
   0x1   :  { %10 = vsyncpa [#allocation5], 0 }
   0x2   :  { %11 = vsyncpa [#allocation8], 0  ;;  %s207_s12 = smov [#allocation3]   ;;  %s135_s16 = scalar_lea.hbm %s277_s0, 16 }
   0x3   :  { %s23_s13 = sshll.u32 %s207_s12, 4  ;;  %p136_p0 = scmp.ne.s32.totalorder %s277_s0, %s135_s16  ;;  %s24_s13 = int_to_ptr.vmem [resolvable:$true] %s23_s13 }
   0x4   :  { %p139_p1 = scmp.lt.u32.totalorder %s135_s16, %s277_s0 }
   0x6   :  { %p141_p2 = pnand %p139_p1, %p136_p0 }
   0x8   :  { %144 = shalt.err (!%p141_p2)
}
   0x9   :  { %s145_s21 = scalar_lea.vmem %s24_s13, 16  ;;  %s149_s22 = scalar_lea.vmem %s24_s13, 32 }
   0xa   :  { %p146_p3 = scmp.ne.s32.totalorder %s24_s13, %s145_s21  ;;  %p150_p4 = scmp.lt.s32.totalorder %s24_s13, %s24_s13 }
   0xb   :  { %p151_p5 = scmp.lt.s32.totalorder %s149_s22, %s145_s21 }
   0xd   :  { %p152_p6 = por %p151_p5, %p150_p4 }
   0xf   :  { %p153_p7 = pnand %p152_p6, %p146_p3 }
  0x11   :  { %156 = shalt.err (!%p153_p7)
}
  0x12   :  { %26 = dma.hbm_to_vmem [thread:$0]  %s277_s0, 16, %s24_s13, [#allocation4]  }
  0x13   :  { %201 = dma.done.wait [#allocation4], 16  }
  0x14   :  { %202 = vsyncadd [#allocation4], 4294967280  ;;  %v68_v0 = vlaneseq  ;;  %v208_v1 = vmov 0.0   ;;  %v65_v6 = vld [vmem:[#allocation3] sm:$0x1]  ;;  %s209_s27 = smov 1  }
  0x15   :  { %63 = vst [vmem:[#allocation6] sm:$0xff] %v208_v1  ;;  %64 = vst [vmem:[#allocation7] sm:$0xff] %v208_v1  ;;  %v66_v7 = vld [vmem:[%s278_s1] sm:$0x1]  ;;  %s210_s0 = smov [#allocation6]  }
  0x16   :  { %v69_v2 = vshrl.u32 %v68_v0, 7  ;;  %v71_v3 = vand.u32 127, %v68_v0  ;;  %v67_v8 = vsub.f32 %v65_v6, %v66_v7  ;;  %s102_s28 = sshll.u32 %s210_s0, 4  ;;  %s103_s28 = int_to_ptr.vmem [resolvable:$true] %s102_s28 }
  0x17   :  { %s157_s29 = scalar_lea.vmem %s103_s28, 128  ;;  %p162_p9 = scmp.lt.s32.totalorder %s103_s28, %s103_s28 }
  0x18   :  { %v75_v4 = vmul.u32 128, %v69_v2  ;;  %81 = vrot.lane.b32.xlu0 %v67_v8, %s209_s27  ;;  %v84_v10 = vmul.f32 %v67_v8, %v67_v8  ;;  %p158_p8 = scmp.ne.s32.totalorder %s103_s28, %s157_s29  ;;  %p163_p10 = scmp.lt.s32.totalorder %s157_s29, %s157_s29 }
  0x1a   :  { %v76_v5 = vadd.s32 %v75_v4, %v71_v3  ;;  %p164_p11 = por %p163_p10, %p162_p9 }
  0x1c   :  { %v77_v9 = vand.u32 7, %v76_v5  ;;  %vm78_vm0 = vcmp.lt.s32.totalorder %v76_v5, 16  ;;  %v88_v11 = vld [vmem:[#allocation6] sm:$0x1]  ;;  %p165_p12 = pnand %p164_p11, %p158_p8 }
  0x1d   :  { %v85_v13 = vsel %vm78_vm0, %v84_v10, 0.0 }
  0x1e   :  { %vm79_vm1 = vcmp.ge.s32.totalorder %v77_v9, 1  ;;  %v90_v14 = vadd.f32 %v88_v11, %v85_v13 }
  0x1f   :  { %vm247_vm2 = vmand %vm78_vm0, %vm79_vm1 }
  0x20   :  { %91 = vst [vmem:[#allocation6] sm:$0x1] %v90_v14 }
  0x21   :  { %168 = shalt.err (!%p165_p12)
}
  0x22   :  { %s169_s4 = scalar_lea.hbm %s279_s2, 128 }
  0x23   :  { %p170_p13 = scmp.ne.s32.totalorder %s279_s2, %s169_s4  ;;  %p173_p0 = scmp.lt.u32.totalorder %s169_s4, %s279_s2 }
  0x25   :  { %p175_p1 = pnand %p173_p0, %p170_p13 }
  0x27   :  { %178 = shalt.err (!%p175_p1)
}
  0x28   :  { %105 = dma.vmem_to_hbm [thread:$0]  %s103_s28, 128, %s279_s2, [#allocation5]   ;;  %v92_v18 = vld [vmem:[#allocation7] sm:$0x1] }
  0x29   :  { %s211_s11 = smov [#allocation7]  }
  0x2a   :  { %s112_s12 = sshll.u32 %s211_s11, 4  ;;  %s113_s12 = int_to_ptr.vmem [resolvable:$true] %s112_s12 }
  0x2b   :  { %s179_s13 = scalar_lea.vmem %s113_s12, 128  ;;  %p184_p3 = scmp.lt.s32.totalorder %s113_s12, %s113_s12 }
  0x2c   :  { %p180_p2 = scmp.ne.s32.totalorder %s113_s12, %s179_s13  ;;  %p185_p4 = scmp.lt.s32.totalorder %s179_s13, %s179_s13 }
  0x2e   :  { %p186_p5 = por %p185_p4, %p184_p3 }
  0x30   :  { %p187_p6 = pnand %p186_p5, %p180_p2 }
  0x8a   :  { %v82_v15 = vpop.permute.xlu0 %81 }
  0x8b   :  { %v83_v16 = vsub.f32 %v67_v8, %v82_v15 }
  0x8d   :  { %v86_v17 = vmul.f32 %v83_v16, %v83_v16 }
  0x8f   :  { %v87_v19 = vsel %vm247_vm2, %v86_v17, 0.0 }
  0x90   :  { %v94_v20 = vadd.f32 %v92_v18, %v87_v19 }
  0x92   :  { %95 = vst [vmem:[#allocation7] sm:$0x1] %v94_v20 }
  0x93   :  { %190 = shalt.err (!%p187_p6)
}
  0x94   :  { %s191_s15 = scalar_lea.hbm %s280_s3, 128 }
  0x95   :  { %p192_p7 = scmp.ne.s32.totalorder %s280_s3, %s191_s15  ;;  %p195_p8 = scmp.lt.u32.totalorder %s191_s15, %s280_s3 }
  0x97   :  { %p197_p9 = pnand %p195_p8, %p192_p7 }
  0x99   :  { %200 = shalt.err (!%p197_p9)
}
  0x9a   :  { %115 = dma.vmem_to_hbm [thread:$0]  %s113_s12, 128, %s280_s3, [#allocation8]  }
  0x9b   :  { %203 = dma.done.wait [#allocation5], 128  }
  0x9c   :  { %204 = vsyncadd [#allocation5], 4294967168 }
  0x9d   :  { %205 = dma.done.wait [#allocation8], 128  }
  0x9e   :  { %206 = vsyncadd [#allocation8], 4294967168 }
  0x9f   :  { %122 = vsyncpa [#allocation4], 1 }
  0xa0   :  { %123 = vsyncpa [#allocation5], 1 }
  0xa1   :  { %124 = vsyncpa [#allocation8], 1 }

</bundles_post_ra>
